<compile_context>
chip_gen: v6e
topology: v6e:2x2x1
jax: 0.10.0
libtpu: 0.0.40
codegen_flags: <defaults>
</compile_context>

<pallas_src>
import jax
import jax.numpy as jnp
from jax.experimental import pallas as pl
from jax.experimental.pallas import tpu as pltpu

LANE = 128


def _round_up(n, m):
    return ((n + m - 1) // m) * m


def _pad2d(a, rows, cols):
    r, c = a.shape
    return jnp.pad(a, ((0, rows - r), (0, cols - c)))


def _pick_tile_b(B):
    # grid >= 2 so the pipeline overlaps tile DMA with compute and (on v7x) both
    # TensorCores get grid iterations; cap at 512 rows so double-buffered f32
    # output tiles stay tiny even under v7x's 64 MiB VMEM.
    if B <= 8:
        return B
    for cand in (512, 256, 128, 64, 32, 16, 8):
        if cand <= B // 2 and B % cand == 0:
            return cand
    return B


def _make_kernel(mix_x1: bool, mix_x2: bool, yeta: float):
    one_m = float(1.0 - yeta)
    yv = float(yeta)

    def kernel(x_ref, ph_ref, px1_ref, px2_ref,
               w1_ref, b1_ref, w2_ref, b2_ref, w3_ref, b3_ref,
               x2_ref, y_ref):
        # Stage 1: prompt-mix on h (all levels), Linear l1, ReLU.  Elementwise
        # math is kept in f32; only the MXU operands are (optionally) bf16.
        h = x_ref[...].astype(jnp.float32)
        a1 = one_m * h + yv * ph_ref[...].astype(jnp.float32)
        x1 = jnp.dot(a1.astype(w1_ref.dtype), w1_ref[...],
                     preferred_element_type=jnp.float32)
        x1 = jnp.maximum(x1 + b1_ref[...].astype(jnp.float32), 0.0)

        # Stage 2: optional prompt-mix on x1 (c2/c3), Linear l2.
        a2 = one_m * x1 + yv * px1_ref[...].astype(jnp.float32) if mix_x1 else x1
        x2 = jnp.dot(a2.astype(w2_ref.dtype), w2_ref[...],
                     preferred_element_type=jnp.float32)
        x2 = x2 + b2_ref[...].astype(jnp.float32)
        x2_ref[...] = x2.astype(x2_ref.dtype)

        # Stage 3: optional prompt-mix on x2 (c3), Linear l3.
        a3 = one_m * x2 + yv * px2_ref[...].astype(jnp.float32) if mix_x2 else x2
        y = jnp.dot(a3.astype(w3_ref.dtype), w3_ref[...],
                    preferred_element_type=jnp.float32)
        y = y + b3_ref[...].astype(jnp.float32)
        y_ref[...] = y.astype(y_ref.dtype)

    return kernel


def re_train_dnn_prompt_forward(
        h, w1, b1, w2, b2, w3, b3,
        prompt_h, prompt_x1=None, prompt_x2=None,
        *, level="c1", yeta=0.1, tile_b=None, use_bf16=True):
    """h: [B, input_dim]; w*: [in, out] (pre-transposed); b*: [out];
       prompts: [1, dim].  Returns (x2 [B, hidden2], y [B, n_classes])."""
    B, in_f = h.shape
    h1 = w1.shape[1]
    h2 = w2.shape[1]
    nc = w3.shape[1]
    assert w1.shape[0] == in_f and w2.shape[0] == h1 and w3.shape[0] == h2
    assert level in ("c1", "c2", "c3")

    mix_x1 = level in ("c2", "c3")
    mix_x2 = level == "c3"

    # Lane-dense padded feature widths.
    in_p = _round_up(in_f, LANE)
    h1_p = _round_up(h1, LANE)
    h2_p = _round_up(h2, LANE)
    nc_p = _round_up(nc, LANE)

    mxu_dt = jnp.bfloat16 if use_bf16 else jnp.float32

    # Zero-pad (padded lanes contribute exactly 0 everywhere, ReLU(0)=0).
    x_p = _pad2d(h, B, in_p).astype(mxu_dt)
    w1_p = _pad2d(w1, in_p, h1_p).astype(mxu_dt)
    w2_p = _pad2d(w2, h1_p, h2_p).astype(mxu_dt)
    w3_p = _pad2d(w3, h2_p, nc_p).astype(mxu_dt)
    b1_p = _pad2d(b1.reshape(1, -1), 1, h1_p).astype(jnp.float32)
    b2_p = _pad2d(b2.reshape(1, -1), 1, h2_p).astype(jnp.float32)
    b3_p = _pad2d(b3.reshape(1, -1), 1, nc_p).astype(jnp.float32)
    ph_p = _pad2d(prompt_h.reshape(1, -1), 1, in_p).astype(jnp.float32)
    px1_p = (jnp.zeros((1, h1_p), jnp.float32) if prompt_x1 is None
             else _pad2d(prompt_x1.reshape(1, -1), 1, h1_p).astype(jnp.float32))
    px2_p = (jnp.zeros((1, h2_p), jnp.float32) if prompt_x2 is None
             else _pad2d(prompt_x2.reshape(1, -1), 1, h2_p).astype(jnp.float32))

    if tile_b is None:
        tile_b = _pick_tile_b(B)
    assert B % tile_b == 0
    assert tile_b == B or tile_b % 8 == 0
    grid = (B // tile_b,)

    # Advisory cost estimate for XLA scheduling around the kernel.
    flops = 2 * B * (in_p * h1_p + h1_p * h2_p + h2_p * nc_p)
    bytes_in = sum(int(a.size) * a.dtype.itemsize for a in
                   (x_p, ph_p, px1_p, px2_p, w1_p, b1_p, w2_p, b2_p, w3_p, b3_p))
    bytes_out = B * h2_p * 4 + B * nc_p * 4
    cost = pl.CostEstimate(flops=flops, transcendentals=0,
                           bytes_accessed=bytes_in + bytes_out)

    kernel = _make_kernel(mix_x1, mix_x2, float(yeta))

    x2_p, y_p = pl.pallas_call(
        kernel,
        out_shape=(jax.ShapeDtypeStruct((B, h2_p), jnp.float32),
                   jax.ShapeDtypeStruct((B, nc_p), jnp.float32)),
        grid_spec=pltpu.PrefetchScalarGridSpec(
            num_scalar_prefetch=0,
            grid=grid,
            in_specs=[
                pl.BlockSpec((tile_b, in_p), lambda i: (i, 0)),    # x tile
                pl.BlockSpec((1, in_p), lambda i: (0, 0)),         # prompt_h
                pl.BlockSpec((1, h1_p), lambda i: (0, 0)),         # prompt_x1
                pl.BlockSpec((1, h2_p), lambda i: (0, 0)),         # prompt_x2
                pl.BlockSpec((in_p, h1_p), lambda i: (0, 0)),      # W1 (resident)
                pl.BlockSpec((1, h1_p), lambda i: (0, 0)),         # b1
                pl.BlockSpec((h1_p, h2_p), lambda i: (0, 0)),      # W2 (resident)
                pl.BlockSpec((1, h2_p), lambda i: (0, 0)),         # b2
                pl.BlockSpec((h2_p, nc_p), lambda i: (0, 0)),      # W3 (resident)
                pl.BlockSpec((1, nc_p), lambda i: (0, 0)),         # b3
            ],
            out_specs=[
                pl.BlockSpec((tile_b, h2_p), lambda i: (i, 0)),    # x2 tile
                pl.BlockSpec((tile_b, nc_p), lambda i: (i, 0)),    # y tile
            ],
        ),
        compiler_params=pltpu.CompilerParams(
            dimension_semantics=("parallel",)),
        cost_estimate=cost,
    )(x_p, ph_p, px1_p, px2_p, w1_p, b1_p, w2_p, b2_p, w3_p, b3_p)

    # Slice padded lanes back off.
    return x2_p[:, :h2], y_p[:, :nc]


if __name__ == "__main__":
    # Shapes consistent with the module: prompt_h/prompt_x1 are (1, 84) and
    # prompt_x2 is (1, 512) => input_dim=84, hidden_dims=(84, 512).
    batch = 16
    input_dim = 84
    hidden_dims = (84, 512)
    n_classes = 10
    yeta = 0.1
    use_bf16 = True

    key = jax.random.PRNGKey(0)
    keys = jax.random.split(key, 10)

    def uinit(k, shape, fan_in):
        bound = 1.0 / (fan_in ** 0.5)
        return jax.random.uniform(k, shape, jnp.float32, -bound, bound)

    # Weights stored pre-transposed to [in, out] (PyTorch keeps [out, in] and
    # computes x @ W.T — identical math).
    w1 = uinit(keys[0], (input_dim, hidden_dims[0]), input_dim)
    b1 = uinit(keys[1], (hidden_dims[0],), input_dim)
    w2 = uinit(keys[2], (hidden_dims[0], hidden_dims[1]), hidden_dims[0])
    b2 = uinit(keys[3], (hidden_dims[1],), hidden_dims[0])
    w3 = uinit(keys[4], (hidden_dims[1], n_classes), hidden_dims[1])
    b3 = uinit(keys[5], (n_classes,), hidden_dims[1])

    # The module zero-initializes the prompt embeddings; use nonzero values so
    # the prompt-mix path is actually exercised numerically.
    prompt_h = 0.5 * jax.random.normal(keys[6], (1, input_dim), jnp.float32)
    prompt_x1 = 0.5 * jax.random.normal(keys[7], (1, hidden_dims[0]), jnp.float32)
    prompt_x2 = 0.5 * jax.random.normal(keys[8], (1, hidden_dims[1]), jnp.float32)

    h = jax.random.normal(keys[9], (batch, input_dim), jnp.float32)

    def ref_forward(level):
        # Pure-JAX reference mirroring the kernel's dtype policy
        # (bf16 MXU operands, f32 accumulation / elementwise).
        cdt = jnp.bfloat16 if use_bf16 else jnp.float32
        xq = h.astype(cdt).astype(jnp.float32)
        a1 = (1.0 - yeta) * xq + yeta * prompt_h
        x1 = jnp.maximum(
            jnp.dot(a1.astype(cdt), w1.astype(cdt),
                    preferred_element_type=jnp.float32) + b1, 0.0)
        a2 = (1.0 - yeta) * x1 + yeta * prompt_x1 if level in ("c2", "c3") else x1
        x2 = jnp.dot(a2.astype(cdt), w2.astype(cdt),
                     preferred_element_type=jnp.float32) + b2
        a3 = (1.0 - yeta) * x2 + yeta * prompt_x2 if level == "c3" else x2
        y = jnp.dot(a3.astype(cdt), w3.astype(cdt),
                    preferred_element_type=jnp.float32) + b3
        return x2, y

    for level in ("c1", "c2", "c3"):
        x2, y = re_train_dnn_prompt_forward(
            h, w1, b1, w2, b2, w3, b3,
            prompt_h,
            prompt_x1 if level in ("c2", "c3") else None,
            prompt_x2 if level == "c3" else None,
            level=level, yeta=yeta, use_bf16=use_bf16)
        x2 = jax.block_until_ready(x2)
        y = jax.block_until_ready(y)

        x2_ref, y_ref = ref_forward(level)
        assert x2.shape == (batch, hidden_dims[1])
        assert y.shape == (batch, n_classes)
        assert jnp.allclose(x2, x2_ref, atol=5e-3, rtol=5e-3), f"x2 mismatch ({level})"
        assert jnp.allclose(y, y_ref, atol=5e-3, rtol=5e-3), f"y mismatch ({level})"

    print("KERNEL_OK")
</pallas_src>

<mosaic_0001>
module attributes {stable_mosaic.version = 11 : i64} {
  func.func @kernel(%arg0: i32, %arg1: memref<8x128xbf16, #tpu.memory_space<vmem>>, %arg2: memref<1x128xf32, #tpu.memory_space<vmem>>, %arg3: memref<1x128xf32, #tpu.memory_space<vmem>>, %arg4: memref<1x512xf32, #tpu.memory_space<vmem>>, %arg5: memref<128x128xbf16, #tpu.memory_space<vmem>>, %arg6: memref<1x128xf32, #tpu.memory_space<vmem>>, %arg7: memref<128x512xbf16, #tpu.memory_space<vmem>>, %arg8: memref<1x512xf32, #tpu.memory_space<vmem>>, %arg9: memref<512x128xbf16, #tpu.memory_space<vmem>>, %arg10: memref<1x128xf32, #tpu.memory_space<vmem>>, %arg11: memref<8x512xf32, #tpu.memory_space<vmem>>, %arg12: memref<8x128xf32, #tpu.memory_space<vmem>>) attributes {dimension_semantics = [#tpu.dimension_semantics<parallel>], iteration_bounds = array<i64: 2>, scalar_prefetch = 0 : i64, scratch_operands = 0 : i64, tpu.core_type = #tpu.core_type<tc>, window_params = [{transform_indices = @transform_0, window_bounds = array<i64: 8, 128>}, {pipeline_mode = #tpu.pipeline_mode<synchronous>, transform_indices = @transform_1, window_bounds = array<i64: 1, 128>}, {pipeline_mode = #tpu.pipeline_mode<synchronous>, transform_indices = @transform_2, window_bounds = array<i64: 1, 128>}, {pipeline_mode = #tpu.pipeline_mode<synchronous>, transform_indices = @transform_3, window_bounds = array<i64: 1, 512>}, {pipeline_mode = #tpu.pipeline_mode<synchronous>, transform_indices = @transform_4, window_bounds = array<i64: 128, 128>}, {pipeline_mode = #tpu.pipeline_mode<synchronous>, transform_indices = @transform_5, window_bounds = array<i64: 1, 128>}, {pipeline_mode = #tpu.pipeline_mode<synchronous>, transform_indices = @transform_6, window_bounds = array<i64: 128, 512>}, {pipeline_mode = #tpu.pipeline_mode<synchronous>, transform_indices = @transform_7, window_bounds = array<i64: 1, 512>}, {pipeline_mode = #tpu.pipeline_mode<synchronous>, transform_indices = @transform_8, window_bounds = array<i64: 512, 128>}, {pipeline_mode = #tpu.pipeline_mode<synchronous>, transform_indices = @transform_9, window_bounds = array<i64: 1, 128>}, {transform_indices = @transform_10, window_bounds = array<i64: 8, 512>}, {transform_indices = @transform_11, window_bounds = array<i64: 8, 128>}]} {
    %c0 = arith.constant 0 : index
    %c0_0 = arith.constant 0 : index
    %0 = vector.load %arg1[%c0, %c0_0] : memref<8x128xbf16, #tpu.memory_space<vmem>>, vector<8x128xbf16>
    %1 = arith.extf %0 : vector<8x128xbf16> to vector<8x128xf32>
    %cst = arith.constant 0.899999976 : f32
    %2 = vector.broadcast %cst : f32 to vector<8x128xf32>
    %3 = arith.mulf %2, %1 : vector<8x128xf32>
    %c0_1 = arith.constant 0 : index
    %c0_2 = arith.constant 0 : index
    %4 = vector.load %arg2[%c0_1, %c0_2] : memref<1x128xf32, #tpu.memory_space<vmem>>, vector<1x128xf32>
    %cst_3 = arith.constant 1.000000e-01 : f32
    %5 = vector.broadcast %cst_3 : f32 to vector<1x128xf32>
    %6 = arith.mulf %5, %4 : vector<1x128xf32>
    %7 = vector.broadcast %6 : vector<1x128xf32> to vector<8x128xf32>
    %8 = arith.addf %3, %7 : vector<8x128xf32>
    %9 = arith.truncf %8 : vector<8x128xf32> to vector<8x128xbf16>
    %c0_4 = arith.constant 0 : index
    %c0_5 = arith.constant 0 : index
    %10 = vector.load %arg5[%c0_4, %c0_5] : memref<128x128xbf16, #tpu.memory_space<vmem>>, vector<128x128xbf16>
    %cst_6 = arith.constant dense<0.000000e+00> : vector<8x128xf32>
    %11 = tpu.matmul %9, %10, %cst_6 {dimension_numbers = #tpu.dot_dimension_numbers<[1], [0], [0], [1], [0, 0, 1, 1], [], []>} : vector<8x128xbf16>, vector<128x128xbf16>, vector<8x128xf32> -> vector<8x128xf32>
    %c0_7 = arith.constant 0 : index
    %c0_8 = arith.constant 0 : index
    %12 = vector.load %arg6[%c0_7, %c0_8] : memref<1x128xf32, #tpu.memory_space<vmem>>, vector<1x128xf32>
    %13 = vector.broadcast %12 : vector<1x128xf32> to vector<8x128xf32>
    %14 = arith.addf %11, %13 : vector<8x128xf32>
    %cst_9 = arith.constant 0.000000e+00 : f32
    %15 = vector.broadcast %cst_9 : f32 to vector<8x128xf32>
    %16 = arith.maximumf %14, %15 : vector<8x128xf32>
    %17 = arith.truncf %16 : vector<8x128xf32> to vector<8x128xbf16>
    %c0_10 = arith.constant 0 : index
    %c0_11 = arith.constant 0 : index
    %18 = vector.load %arg7[%c0_10, %c0_11] : memref<128x512xbf16, #tpu.memory_space<vmem>>, vector<128x512xbf16>
    %cst_12 = arith.constant dense<0.000000e+00> : vector<8x512xf32>
    %19 = tpu.matmul %17, %18, %cst_12 {dimension_numbers = #tpu.dot_dimension_numbers<[1], [0], [0], [1], [0, 0, 1, 1], [], []>} : vector<8x128xbf16>, vector<128x512xbf16>, vector<8x512xf32> -> vector<8x512xf32>
    %c0_13 = arith.constant 0 : index
    %c0_14 = arith.constant 0 : index
    %20 = vector.load %arg8[%c0_13, %c0_14] : memref<1x512xf32, #tpu.memory_space<vmem>>, vector<1x512xf32>
    %21 = vector.broadcast %20 : vector<1x512xf32> to vector<8x512xf32>
    %22 = arith.addf %19, %21 : vector<8x512xf32>
    %c0_15 = arith.constant 0 : index
    %c0_16 = arith.constant 0 : index
    %23 = vector.load %arg11[%c0_15, %c0_16] : memref<8x512xf32, #tpu.memory_space<vmem>>, vector<8x512xf32>
    tpu.vector_store %arg11[%c0_15, %c0_16], %22 {strides = array<i32>} : memref<8x512xf32, #tpu.memory_space<vmem>>, vector<8x512xf32>,
    %24 = arith.truncf %22 : vector<8x512xf32> to vector<8x512xbf16>
    %c0_17 = arith.constant 0 : index
    %c0_18 = arith.constant 0 : index
    %25 = vector.load %arg9[%c0_17, %c0_18] : memref<512x128xbf16, #tpu.memory_space<vmem>>, vector<512x128xbf16>
    %cst_19 = arith.constant dense<0.000000e+00> : vector<8x128xf32>
    %26 = tpu.matmul %24, %25, %cst_19 {dimension_numbers = #tpu.dot_dimension_numbers<[1], [0], [0], [1], [0, 0, 1, 1], [], []>} : vector<8x512xbf16>, vector<512x128xbf16>, vector<8x128xf32> -> vector<8x128xf32>
    %c0_20 = arith.constant 0 : index
    %c0_21 = arith.constant 0 : index
    %27 = vector.load %arg10[%c0_20, %c0_21] : memref<1x128xf32, #tpu.memory_space<vmem>>, vector<1x128xf32>
    %28 = vector.broadcast %27 : vector<1x128xf32> to vector<8x128xf32>
    %29 = arith.addf %26, %28 : vector<8x128xf32>
    %c0_22 = arith.constant 0 : index
    %c0_23 = arith.constant 0 : index
    %30 = vector.load %arg12[%c0_22, %c0_23] : memref<8x128xf32, #tpu.memory_space<vmem>>, vector<8x128xf32>
    tpu.vector_store %arg12[%c0_22, %c0_23], %29 {strides = array<i32>} : memref<8x128xf32, #tpu.memory_space<vmem>>, vector<8x128xf32>,
    return
  }
  func.func @transform_0(%arg0: i32) -> (i32, i32) {
    %c0_i32 = arith.constant 0 : i32
    %c0_i32_0 = arith.constant 0 : i32
    return %arg0, %c0_i32 : i32, i32
  }
  func.func @transform_1(%arg0: i32) -> (i32, i32) {
    %c0_i32 = arith.constant 0 : i32
    %c0_i32_0 = arith.constant 0 : i32
    %c0_i32_1 = arith.constant 0 : i32
    return %c0_i32, %c0_i32_0 : i32, i32
  }
  func.func @transform_2(%arg0: i32) -> (i32, i32) {
    %c0_i32 = arith.constant 0 : i32
    %c0_i32_0 = arith.constant 0 : i32
    %c0_i32_1 = arith.constant 0 : i32
    return %c0_i32, %c0_i32_0 : i32, i32
  }
  func.func @transform_3(%arg0: i32) -> (i32, i32) {
    %c0_i32 = arith.constant 0 : i32
    %c0_i32_0 = arith.constant 0 : i32
    %c0_i32_1 = arith.constant 0 : i32
    return %c0_i32, %c0_i32_0 : i32, i32
  }
  func.func @transform_4(%arg0: i32) -> (i32, i32) {
    %c0_i32 = arith.constant 0 : i32
    %c0_i32_0 = arith.constant 0 : i32
    %c0_i32_1 = arith.constant 0 : i32
    return %c0_i32, %c0_i32_0 : i32, i32
  }
  func.func @transform_5(%arg0: i32) -> (i32, i32) {
    %c0_i32 = arith.constant 0 : i32
    %c0_i32_0 = arith.constant 0 : i32
    %c0_i32_1 = arith.constant 0 : i32
    return %c0_i32, %c0_i32_0 : i32, i32
  }
  func.func @transform_6(%arg0: i32) -> (i32, i32) {
    %c0_i32 = arith.constant 0 : i32
    %c0_i32_0 = arith.constant 0 : i32
    %c0_i32_1 = arith.constant 0 : i32
    return %c0_i32, %c0_i32_0 : i32, i32
  }
  func.func @transform_7(%arg0: i32) -> (i32, i32) {
    %c0_i32 = arith.constant 0 : i32
    %c0_i32_0 = arith.constant 0 : i32
    %c0_i32_1 = arith.constant 0 : i32
    return %c0_i32, %c0_i32_0 : i32, i32
  }
  func.func @transform_8(%arg0: i32) -> (i32, i32) {
    %c0_i32 = arith.constant 0 : i32
    %c0_i32_0 = arith.constant 0 : i32
    %c0_i32_1 = arith.constant 0 : i32
    return %c0_i32, %c0_i32_0 : i32, i32
  }
  func.func @transform_9(%arg0: i32) -> (i32, i32) {
    %c0_i32 = arith.constant 0 : i32
    %c0_i32_0 = arith.constant 0 : i32
    %c0_i32_1 = arith.constant 0 : i32
    return %c0_i32, %c0_i32_0 : i32, i32
  }
  func.func @transform_10(%arg0: i32) -> (i32, i32) {
    %c0_i32 = arith.constant 0 : i32
    %c0_i32_0 = arith.constant 0 : i32
    return %arg0, %c0_i32 : i32, i32
  }
  func.func @transform_11(%arg0: i32) -> (i32, i32) {
    %c0_i32 = arith.constant 0 : i32
    %c0_i32_0 = arith.constant 0 : i32
    return %arg0, %c0_i32 : i32, i32
  }
}

</mosaic_0001>

<bundles_post_ra>
// kernel: tpu_custom_call.1
= control target key start
LH: loop header
LB: loop body
LE: loop exit
PB: predicated region body
PF: predicated region fallthrough
CT: control target
= control target key end

     0   :  { %s2397_s0 = inlined_call_operand.hbm [shape: bf16[16,128], index: 0, kind: input, shape index: {}]   ;;  %s2398_s1 = inlined_call_operand.vmem [shape: f32[1,128], index: 1, kind: input, shape index: {}]   ;;  %s2399_s2 = inlined_call_operand.hbm [shape: f32[1,128], index: 2, kind: input, shape index: {}]   ;;  %s2400_s3 = inlined_call_operand.vmem [shape: f32[1,512], index: 3, kind: input, shape index: {}]   ;;  %s2401_s4 = inlined_call_operand.hbm [shape: bf16[128,128], index: 4, kind: input, shape index: {}]   ;;  %s2402_s5 = inlined_call_operand.hbm [shape: f32[1,128], index: 5, kind: input, shape index: {}]   ;;  %s2403_s6 = inlined_call_operand.hbm [shape: bf16[128,512], index: 6, kind: input, shape index: {}]   ;;  %s2404_s7 = inlined_call_operand.vmem [shape: f32[1,512], index: 7, kind: input, shape index: {}]   ;;  %s2405_s8 = inlined_call_operand.hbm [shape: bf16[512,128], index: 8, kind: input, shape index: {}]   ;;  %s2406_s9 = inlined_call_operand.vmem [shape: f32[1,128], index: 9, kind: input, shape index: {}]   ;;  %s2407_s10 = inlined_call_operand.hbm [shape: f32[16,512], index: 10, kind: output, shape index: {0}]   ;;  %s2408_s11 = inlined_call_operand.hbm [shape: f32[16,128], index: 11, kind: output, shape index: {1}]  }
   0x1   :  { %2413 = sst [smem:[#allocation22_spill]] %s2399_s2 }
   0x2   :  { %2414 = sst [smem:[#allocation23_spill]] %s2401_s4 }
   0x3   :  { %2415 = sst [smem:[#allocation24_spill]] %s2402_s5 }
   0x4   :  { %2416 = sst [smem:[#allocation25_spill]] %s2403_s6 }
   0x5   :  { %2417 = sst [smem:[#allocation26_spill]] %s2405_s8 }
   0x6   :  { %17 = vsyncpa [#allocation3], 0 }
   0x7   :  { %19 = vsyncpa [#allocation3 + $0x1], 0 }
   0x8   :  { %20 = vsyncpa [#allocation6], 0 }
   0x9   :  { %21 = vsyncpa [#allocation9], 0 }
   0xa   :  { %22 = vsyncpa [#allocation12], 0 }
   0xb   :  { %23 = vsyncpa [#allocation4], 0 }
   0xc   :  { %25 = vsyncpa [#allocation4 + $0x1], 0 }
   0xd   :  { %26 = vsyncpa [#allocation15], 0 }
   0xe   :  { %28 = vsyncpa [#allocation15 + $0x1], 0  ;;  %s2152_s16 = smov 0   ;;  %s2154_s17 = smov 0  }
   0xf   :  { %s2156_s18 = smov 0   ;;  %s2158_s19 = smov 0  }
  0x10 LB: > { %s2077_s20 = smov [#allocation5]   ;;  %s2173_s22 = sadd.s32 4294967295, %s2075_s19   ;;  %s2075_s19 = sphi %s2158_s19, %s2445_s19   ;;  %s2071_s18 = sphi %s2156_s18, %s2444_s18   ;;  %s2067_s17 = sphi %s2154_s17, %s2443_s17   ;;  %s2063_s16 = sphi %s2152_s16, %s2442_s16  }
  0x11   : > { %s322_s21 = sshll.u32 %s2077_s20, 4  ;;  %p1441_p0 = scmp.ge.s32.totalorder %s2075_s19, 1  ;;  %s323_s21 = int_to_ptr.vmem [resolvable:$true] %s322_s21 }
  0x12   : > { %p2409_p1 = scmp.eq.s32.totalorder %s2173_s22, 0  ;;  %p306_p2 = scmp.lt.s32.totalorder %s2075_s19, 3 }
  0x13   : > { %s2078_s24 = smov [#allocation8]   ;;  %s2079_s26 = smov [#allocation7]  }
  0x14   : > { %p2178_p3 = pnand %p1441_p0, %p306_p2  ;;  %s349_s25 = sshll.u32 %s2078_s24, 4  ;;  %s350_s25 = int_to_ptr.vmem [resolvable:$true] %s349_s25 }
  0x15   : > { %s335_s27 = sshll.u32 %s2079_s26, 4  ;;  %s1822_s30 = scalar_lea.vmem %s323_s21, 16  ;;  %s2191_s27 = int_to_ptr.vmem [resolvable:$true] %s335_s27 }
  0x16   : > { %s2418_s23 = scalar_select %p2178_p3, 1, 0 }
  0x17   : > { %p1640_p5 = pneg %p2178_p3  ;;  %p1823_p8 = scmp.ne.s32.totalorder %s323_s21, %s1822_s30 }
  0x18   : > { %s1829_s12 = scalar_lea.vmem %s323_s21, 32  ;;  %p1830_p11 = scmp.lt.s32.totalorder %s323_s21, %s323_s21 }
  0x19   : > { %p2187_p6 = pnand %p1640_p5, %p2409_p1  ;;  %p1831_p12 = scmp.lt.s32.totalorder %s1829_s12, %s1822_s30 }
  0x1b   : > { %p2195_p7 = pneg %p2187_p6  ;;  %p1832_p13 = por %p1831_p12, %p1830_p11 }
  0x1d   : > { %p1825_p9 = pnand %p1823_p8, %p2195_p7 }
  0x1f   : > { %p1826_p10 = pneg %p1825_p9 }
  0x21   : > { %p1833_p0 = pnand %p1832_p13, %p1826_p10 }
  0x23   : > { %1836 = shalt.err (!%p1833_p0)
}
  0x24   : > { %s2421_s2 = sld [smem:[#allocation22_spill]]  ;;  %s1848_s14 = scalar_lea.vmem %s350_s25, 16 }
  0x25   : > { %p1849_p2 = scmp.ne.s32.totalorder %s350_s25, %s1848_s14  ;;  %s1855_s15 = scalar_lea.vmem %s350_s25, 32 }
  0x26   : > { %p1856_p8 = scmp.lt.s32.totalorder %s350_s25, %s350_s25  ;;  %p1857_p9 = scmp.lt.s32.totalorder %s1855_s15, %s1848_s14 }
  0x27   : > { %p1851_p5 = pnand %p1849_p2, %p2195_p7 }
  0x28   : > { %p1858_p1 = por %p1857_p9, %p1856_p8 }
  0x29   : > { %p1852_p4 = pneg %p1851_p5 }
  0x2a   : > { %1643 = dma.hbm_to_vmem [thread:$0]  (!%p2187_p6), %s2421_s2, 16, %s323_s21, [#allocation6]  }
  0x2b   : > { %p1859_p3 = pnand %p1858_p1, %p1852_p4 }
  0x2d   : > { %1862 = shalt.err (!%p1859_p3)
}
  0x2e   : > { %s2422_s5 = sld [smem:[#allocation24_spill]]  ;;  %s1874_s21 = scalar_lea.vmem %s2191_s27, 1024 }
  0x2f   : > { %p1875_p10 = scmp.ne.s32.totalorder %s2191_s27, %s1874_s21  ;;  %p1882_p13 = scmp.lt.s32.totalorder %s2191_s27, %s2191_s27 }
  0x30   : > { %p1883_p0 = scmp.lt.s32.totalorder %s1874_s21, %s1874_s21 }
  0x31   : > { %p1877_p11 = pnand %p1875_p10, %p2195_p7 }
  0x32   : > { %p1884_p1 = por %p1883_p0, %p1882_p13 }
  0x33   : > { %p1878_p12 = pneg %p1877_p11 }
  0x34   : > { %1649 = dma.hbm_to_vmem [thread:$0]  (!%p2187_p6), %s2422_s5, 16, %s350_s25, [#allocation9]  }
  0x35   : > { %p1885_p3 = pnand %p1884_p1, %p1878_p12 }
  0x37   : > { %1888 = shalt.err (!%p1885_p3)
}
  0x38   : > { %s2080_s26 = smov 64   ;;  %s2081_s30 = smov 4  }
  0x39   : > { %s2423_s4 = sld [smem:[#allocation23_spill]]  ;;  %s2082_s13 = smov [#allocation10]  }
  0x3a   : > { %s359_s3 = sshll.u32 %s2082_s13, 4  ;;  %s360_s3 = int_to_ptr.vmem [resolvable:$true] %s359_s3 }
  0x3b   : > { %s1900_s14 = scalar_lea.vmem %s360_s3, 4096  ;;  %p1908_p8 = scmp.lt.s32.totalorder %s360_s3, %s360_s3 }
  0x3c   : > { %p1901_p4 = scmp.ne.s32.totalorder %s360_s3, %s1900_s14  ;;  %p1909_p9 = scmp.lt.s32.totalorder %s1900_s14, %s1900_s14 }
  0x3e   : > { %p1903_p2 = pnand %p1901_p4, %p2195_p7  ;;  %p1910_p10 = por %p1909_p9, %p1908_p8 }
  0x3f   : > { %1646 = dma.hbm_to_vmem [thread:$0]  (!%p2187_p6), %s2423_s4, 1024, %s2191_s27, [#allocation6], %s2080_s26, %s2080_s26, %s2081_s30  }
  0x40   : > { %p1904_p5 = pneg %p1903_p2 }
  0x42   : > { %p1911_p11 = pnand %p1910_p10, %p1904_p5 }
  0x44   : > { %1914 = shalt.err (!%p1911_p11)
}
  0x45   : > { %s2083_s15 = smov 256   ;;  %s2084_s20 = smov 16  }
  0x46   : > { %s2424_s6 = sld [smem:[#allocation25_spill]]  ;;  %s2085_s21 = smov [#allocation11]  }
  0x47   : > { %s375_s25 = sshll.u32 %s2085_s21, 4  ;;  %s376_s25 = int_to_ptr.vmem [resolvable:$true] %s375_s25 }
  0x48   : > { %s1926_s12 = scalar_lea.vmem %s376_s25, 4096  ;;  %p1934_p1 = scmp.lt.s32.totalorder %s376_s25, %s376_s25 }
  0x49   : > { %p1927_p12 = scmp.ne.s32.totalorder %s376_s25, %s1926_s12  ;;  %p1935_p3 = scmp.lt.s32.totalorder %s1926_s12, %s1926_s12 }
  0x4b   : > { %p1929_p13 = pnand %p1927_p12, %p2195_p7  ;;  %p1936_p4 = por %p1935_p3, %p1934_p1 }
  0x4c   : > { %1652 = dma.hbm_to_vmem [thread:$0]  (!%p2187_p6), %s2424_s6, 4096, %s360_s3, [#allocation9], %s2083_s15, %s2083_s15, %s2084_s20  }
  0x4d   : > { %p1930_p0 = pneg %p1929_p13 }
  0x4f   : > { %p1937_p2 = pnand %p1936_p4, %p1930_p0 }
  0x51   : > { %1940 = shalt.err (!%p1937_p2)
}
  0x52   : > { %s2425_s8 = sld [smem:[#allocation26_spill]]  ;;  %s1440_s28 = sadd.s32 4294967294, %s2075_s19  }
  0x53   : > { %s2247_s29 = sadd.s32 1, %s2075_s19   ;;  %s41_s14 = sadd.s32 1, %s2071_s18 }
  0x54   : > { %s38_s15 = ssub.s32 %s2075_s19, %s2247_s29  ;;  %p48_p7 = scmp.ne.s32.totalorder %s2071_s18, %s2067_s17 }
  0x55   : > { %p39_p5 = scmp.eq.s32.totalorder %s38_s15, 0  ;;  %p49_p8 = scmp.eq.s32.totalorder %s2075_s19, 0 }
  0x56   : > { %p54_p9 = scmp.ne.s32.totalorder %s2067_s17, %s2063_s16  ;;  %p267_p10 = scmp.eq.s32.totalorder %s2173_s22, 1 }
  0x57   : > { %s2259_s20 = scalar_select %p39_p5, %s2071_s18, %s41_s14  }
  0x58   : > { %1655 = dma.hbm_to_vmem [thread:$0]  (!%p2187_p6), %s2425_s8, 4096, %s376_s25, [#allocation12], %s2080_s26, %s2080_s26, %s2081_s30  }
  0x59   : > { %p50_p11 = por %p49_p8, %p48_p7  ;;  %p2426_p12 = scmp.eq.s32.totalorder %s2173_s22, 0 }
  0x5a   : > { %p2267_p6 = por %p267_p10, %p48_p7  ;;  %p273_p0 = scmp.eq.s32.totalorder %s1440_s28, 1 }
  0x5b   : > { %p2263_p13 = por %p2426_p12, %p54_p9  ;;  %p1672_p1 = scmp.lt.s32.totalorder %s2075_s19, 2 }
  0x5c   : > { %s2428_s26 = scalar_select %p2267_p6, 1, 0 }
  0x5d   : > { %s2427_s24 = scalar_select %p2263_p13, 1, 0 }
  0x5e   : > { %s392_s30 = sand.u32 1, %s2071_s18   ;;  %p2273_p3 = por %p273_p0, %p54_p9 }
  0x5f   : > { %s1448_s21 = sshll.u32 %s392_s30, 2  ;;  %s1449_s25 = sshll.u32 %s2075_s19, 6 }
  0x60   : > { %s2429_s27 = scalar_select %p2273_p3, 1, 0 }
  0x61   : > { %s2281_s3 = scalar_lea.hbm %s2397_s0, %s1449_s25  ;;  %s396_s14 = scalar_lea.vmem [#allocation2], %s1448_s21 }
  0x62   : > { %s403_s15 = sshll.u32 %s396_s14, 4  ;;  %p2283_p4 = pnand %p1672_p1, %p50_p11  ;;  %s404_s15 = int_to_ptr.vmem [resolvable:$true] %s403_s15 }
  0x63   : > { %s393_s2 = scalar_lea.sflag [#allocation3], %s392_s30  ;;  %s1941_s4 = scalar_lea.hbm %s2281_s3, 64 }
  0x64   : > { %p1942_p2 = scmp.ne.s32.totalorder %s2281_s3, %s1941_s4  ;;  %p1943_p7 = pneg %p2283_p4 }
  0x65   : > { %s1946_s13 = scalar_lea.hbm %s2397_s0, 128  ;;  %p1947_p9 = scmp.lt.s32.totalorder %s2281_s3, %s2397_s0 }
  0x66   : > { %p1944_p5 = pnand %p1943_p7, %p1942_p2  ;;  %p1948_p10 = scmp.lt.s32.totalorder %s1946_s13, %s1941_s4 }
  0x68   : > { %p1945_p8 = pneg %p1944_p5  ;;  %p1949_p11 = por %p1948_p10, %p1947_p9 }
  0x6a   : > { %p1950_p12 = pnand %p1949_p11, %p1945_p8 }
  0x6c   : > { %1953 = shalt.err (!%p1950_p12)
}
  0x6d   : > { %s1954_s14 = scalar_lea.vmem %s404_s15, 64  ;;  %s2086_s30 = smov [#allocation2]  }
  0x6e   : > { %p1955_p0 = scmp.ne.s32.totalorder %s404_s15, %s1954_s14  ;;  %s1959_s6 = sshll.u32 %s2086_s30, 4  ;;  %s1960_s6 = int_to_ptr.vmem [resolvable:$false] %s1959_s6 }
  0x6f   : > { %s1961_s8 = scalar_lea.vmem %s1960_s6, 128  ;;  %p1962_p2 = scmp.lt.s32.totalorder %s404_s15, %s1960_s6 }
  0x70   : > { %p1957_p1 = pnand %p1955_p0, %p1943_p7  ;;  %p1963_p5 = scmp.lt.s32.totalorder %s1961_s8, %s1954_s14 }
  0x72   : > { %p1958_p3 = pneg %p1957_p1  ;;  %p1964_p6 = por %p1963_p5, %p1962_p2 }
  0x74   : > { %p1965_p13 = pnand %p1964_p6, %p1958_p3 }
  0x76   : > { %1968 = shalt.err (!%p1965_p13)
}
  0x77   : > { %1659 = dma.hbm_to_vmem [thread:$0]  (!%p2283_p4), %s2281_s3, 64, %s404_s15, %s393_s2  }
  0x78   : > { %p2431_p8 = scmp.ne.s32.totalorder %s2418_s23, 0 }
  0x79   : > { %s2304_s4 = sand.u32 (!%p2431_p8), 1, %s2067_s17   ;;  %p2432_p7 = scmp.ne.s32.totalorder (!%p2431_p8), %s2427_s24, 0 }
  0x7a   : > { %412 = sbr.rel (%p2431_p8) target bundleno = 784 (0x310), region = 60  ;;  %s1451_s5 = sshll.u32 (!%p2431_p8), %s2304_s4, 2 }
  0x7b   : > { %s415_s25 = scalar_lea.sflag (!%p2431_p8), [#allocation3], %s2304_s4  ;;  %s418_s6 = scalar_lea.vmem (!%p2431_p8), [#allocation2], %s1451_s5 }
  0x7f   : > { %2038 = dma.done.wait (%p2432_p7), %s415_s25, 64  }
  0x80   : > { %2040 = vsyncadd (%p2432_p7), %s415_s25, 4294967232  ;;  %p2433_p13 = scmp.eq.s32.totalorder %s2173_s22, 0 }
  0x82   : > { %2042 = dma.done.wait (%p2433_p13), [#allocation6], 1040   ;;  %p2434_p6 = pmov %p2433_p13 }
  0x84   : > { %2044 = vsyncadd (%p2434_p6), [#allocation6], 4294966256  ;;  %p2435_p3 = pmov %p2434_p6 }
  0x86   : > { %2046 = dma.done.wait (%p2435_p3), [#allocation9], 4112   ;;  %p2436_p4 = pmov %p2435_p3 }
  0x87   : > { %p2437_p9 = pmov %p2435_p3 }
  0x88   : > { %2048 = vsyncadd (%p2436_p4), [#allocation9], 4294963184 }
  0x89   : > { %2050 = dma.done.wait (%p2437_p9), [#allocation12], 4096   ;;  %p2438_p10 = pmov %p2435_p3 }
  0x8a   : > { %v2087_v0 = vmov 0.0   ;;  %vm2088_vm0 = vmmov 0   ;;  %v1723_v1 = vld [vmem:[#allocation7 + $0x38] sm:$0xff]   ;;  %v1724_v2 = vld [vmem:[#allocation7 + $0x30] sm:$0xff]   ;;  %v1725_v3 = vld [vmem:[#allocation7 + $0x28] sm:$0xff]   ;;  %v489_v4 = vlaneseq  ;;  %v2089_v52 = vmov 0  }
  0x8b   : > { %2052 = vsyncadd (%p2438_p10), [#allocation12], 4294963200  ;;  %1594 = vmatprep.subr.bf16.mxu0 %v2087_v0  ;;  %1610 = vmatprep.mubr.msk.bf16.mxu0 %vm2088_vm0, %v2087_v0  ;;  %v1731_v5 = vld [vmem:[#allocation10 + $0xe4] ss:$16 sps:$4 sm:$0xff]   ;;  %v1736_v7 = vld [vmem:[#allocation10 + $0xe0] ss:$16 sps:$4 sm:$0xff]  }
  0x8c   : > { %1595 = vmatpush3.bf16.msra.mxu0 %v1723_v1  ;;  %v1726_v6 = vld [vmem:[#allocation7 + $0x20] sm:$0xff]   ;;  %823 = vmatprep.subr.bf16.mxu1 %v1731_v5  ;;  %v1727_v8 = vld [vmem:[#allocation7 + $0x18] sm:$0xff]   ;;  %v2324_v9 = vshrl.u32 %v489_v4, 7  ;;  %v486_v12 = vld [vmem:[%s2398_s1] sm:$0x1]  ;;  %s1457_s3 = sshll.u32 %s2304_s4, 5 }
  0x8d   : > { %1596 = vmatprep.subr.bf16.mxu0 %v2087_v0  ;;  %v1737_v10 = vld [vmem:[#allocation10 + $0xc4] ss:$16 sps:$4 sm:$0xff]   ;;  %824 = vmatpush1.bf16.msra.mxu1 %v1736_v7  ;;  %v1742_v13 = vld [vmem:[#allocation10 + $0xc0] ss:$16 sps:$4 sm:$0xff]   ;;  %v487_v17 = vmul.f32 0.1, %v486_v12 }
  0x8e   : > { %v483_v11 = vld [vmem:[%s418_s6] sm:$0xf]  ;;  %825 = vmatprep.subr.bf16.mxu1 %v1737_v10  ;;  %v491_v15 = vsub.s32 0, %v2324_v9  ;;  %v1748_v18 = vld [vmem:[#allocation10 + $0xa0] ss:$16 sps:$4 sm:$0xff]   ;;  %v1729_v21 = vld [vmem:[#allocation7 + $0x8] sm:$0xff]   ;;  %855 = vmatprep.mubr.bf16.mxu1 %v2089_v52 }
  0x8f   : > { %v1743_v14 = vld [vmem:[#allocation10 + $0xa4] ss:$16 sps:$4 sm:$0xff]   ;;  %v484_v16 = vunpack.c.l.bf16 %v483_v11  ;;  %v1754_v24 = vld [vmem:[#allocation10 + $0x80] ss:$16 sps:$4 sm:$0xff]   ;;  %v1735_v29 = vld [vmem:[#allocation10 + $0xec] ss:$16 sps:$4 sm:$0xff]  }
  0x90   : > { %1597 = vmatpush3.bf16.msra.mxu0 %v1724_v2  ;;  %v1728_v19 = vld [vmem:[#allocation7 + $0x10] sm:$0xff]   ;;  %v492_v23 = vrot.slane %v487_v17, %v491_v15  ;;  %v1730_v26 = vld [vmem:[#allocation7] sm:$0xff]   ;;  %v1733_v32 = vld [vmem:[#allocation10 + $0xe8] ss:$16 sps:$4 sm:$0xff]   ;;  %s474_s15 = scalar_lea.vmem [#allocation13], %s1457_s3  ;;  %s1540_s28 = sshll.u32 %s2173_s22, 9 }
  0x91   : > { %1598 = vmatprep.subr.bf16.mxu0 %v2087_v0  ;;  %826 = vmatpush1.bf16.msra.mxu1 %v1742_v13  ;;  %v1749_v20 = vld [vmem:[#allocation10 + $0x84] ss:$16 sps:$4 sm:$0xff]   ;;  %v485_v22 = vmul.f32 0.9, %v484_v16  ;;  %v1760_v28 = vld [vmem:[#allocation10 + $0x60] ss:$16 sps:$4 sm:$0xff]   ;;  %s1275_s21 = scalar_lea.hbm %s2407_s10, %s1540_s28 }
  0x92   : > { %827 = vmatprep.subr.bf16.mxu1 %v1743_v14  ;;  %v1755_v25 = vld [vmem:[#allocation10 + $0x64] ss:$16 sps:$4 sm:$0xff]   ;;  %v1766_v31 = vld [vmem:[#allocation10 + $0x40] ss:$16 sps:$4 sm:$0xff]   ;;  %v1741_v35 = vld [vmem:[#allocation10 + $0xcc] ss:$16 sps:$4 sm:$0xff]  }
  0x93   : > { %v494_v27 = vadd.f32 %v492_v23, %v485_v22  ;;  %v1761_v30 = vld [vmem:[#allocation10 + $0x44] ss:$16 sps:$4 sm:$0xff]   ;;  %v1739_v36 = vld [vmem:[#allocation10 + $0xc8] ss:$16 sps:$4 sm:$0xff]   ;;  %v1747_v37 = vld [vmem:[#allocation10 + $0xac] ss:$16 sps:$4 sm:$0xff]  }
  0x94   : > { %1599 = vmatpush3.bf16.msra.mxu0 %v1725_v3  ;;  %v1767_v33 = vld [vmem:[#allocation10 + $0x24] ss:$16 sps:$4 sm:$0xff]   ;;  %v1745_v38 = vld [vmem:[#allocation10 + $0xa8] ss:$16 sps:$4 sm:$0xff]   ;;  %v1753_v39 = vld [vmem:[#allocation10 + $0x8c] ss:$16 sps:$4 sm:$0xff]  }
  0x95   : > { %1600 = vmatprep.subr.bf16.mxu0 %v2087_v0  ;;  %828 = vmatpush1.bf16.msra.mxu1 %v1748_v18  ;;  %v495_v34 = vpack.c.bf16 %v494_v27, %v494_v27  ;;  %v1751_v40 = vld [vmem:[#allocation10 + $0x88] ss:$16 sps:$4 sm:$0xff]   ;;  %v1759_v41 = vld [vmem:[#allocation10 + $0x6c] ss:$16 sps:$4 sm:$0xff]   ;;  %v1772_v47 = vld [vmem:[#allocation10 + $0x20] ss:$16 sps:$4 sm:$0xff]  }
  0x96   : > { %829 = vmatprep.subr.bf16.mxu1 %v1749_v20  ;;  %v1757_v42 = vld [vmem:[#allocation10 + $0x68] ss:$16 sps:$4 sm:$0xff]   ;;  %v1765_v43 = vld [vmem:[#allocation10 + $0x4c] ss:$16 sps:$4 sm:$0xff]   ;;  %v1773_v48 = vld [vmem:[#allocation10 + $0x4] ss:$16 sps:$4 sm:$0xff]  }
  0x97   : > { %v1763_v44 = vld [vmem:[#allocation10 + $0x48] ss:$16 sps:$4 sm:$0xff]   ;;  %v1771_v45 = vld [vmem:[#allocation10 + $0x2c] ss:$16 sps:$4 sm:$0xff]   ;;  %v1778_v51 = vld [vmem:[#allocation10] ss:$16 sps:$4 sm:$0xff]  }
  0x98   : > { %1601 = vmatpush3.bf16.msra.mxu0 %v1726_v6  ;;  %v1769_v46 = vld [vmem:[#allocation10 + $0x28] ss:$16 sps:$4 sm:$0xff]   ;;  %v1777_v49 = vld [vmem:[#allocation10 + $0xc] ss:$16 sps:$4 sm:$0xff]   ;;  %v1784_v1 = vld [vmem:[#allocation11 + $0xf0] sm:$0xff]   ;;  %s1277_s14 = sshll.u32 %s474_s15, 4  ;;  %s1278_s14 = int_to_ptr.vmem [resolvable:$true] %s1277_s14 }
  0x99   : > { %1602 = vmatprep.subr.bf16.mxu0 %v2087_v0  ;;  %830 = vmatpush1.bf16.msra.mxu1 %v1754_v24  ;;  %v1775_v50 = vld [vmem:[#allocation10 + $0x8] ss:$16 sps:$4 sm:$0xff]   ;;  %v1459_v55 = vld [vmem:[#allocation8] ss:$0 sm:$0xff]  ;;  %v1785_v3 = vld [vmem:[#allocation11 + $0x30] sm:$0xff]   ;;  %s1258_s30 = scalar_lea.sflag [#allocation4], %s2304_s4 }
  0x9a   : > { %831 = vmatprep.subr.bf16.mxu1 %v1755_v25  ;;  %v1779_v53 = vld [vmem:[#allocation11 + $0x78] sm:$0xff]   ;;  %v1786_v4 = vld [vmem:[#allocation11 + $0xb0] sm:$0xff]   ;;  %v1787_v5 = vld [vmem:[#allocation11 + $0x68] sm:$0xff]   ;;  %s1969_s5 = scalar_lea.vmem %s1278_s14, 512  ;;  %p2439_p12 = scmp.ne.s32.totalorder %s2428_s26, 0 }
  0x9b   : > { %v1780_v54 = vld [vmem:[#allocation11 + $0xf8] sm:$0xff]   ;;  %v1788_v6 = vld [vmem:[#allocation11 + $0xe8] sm:$0xff]   ;;  %v1791_v10 = vld [vmem:[#allocation11 + $0x60] sm:$0xff]   ;;  %p1970_p11 = scmp.ne.s32.totalorder %s1278_s14, %s1969_s5  ;;  %s2090_s25 = smov [#allocation13]  }
  0x9c   : > { %1603 = vmatpush3.bf16.msra.mxu0 %v1727_v8  ;;  %v1781_v61 = vld [vmem:[#allocation11 + $0x38] sm:$0xff]   ;;  %v1789_v7 = vld [vmem:[#allocation11 + $0x28] sm:$0xff]   ;;  %v1792_v11 = vld [vmem:[#allocation11 + $0xe0] sm:$0xff]   ;;  %s1973_s6 = sshll.u32 %s2090_s25, 4  ;;  %s1974_s6 = int_to_ptr.vmem [resolvable:$false] %s1973_s6 }
  0x9d   : > { %1604 = vmatprep.subr.bf16.mxu0 %v2087_v0  ;;  %832 = vmatpush1.bf16.msra.mxu1 %v1760_v28  ;;  %v1782_v62 = vld [vmem:[#allocation11 + $0xb8] sm:$0xff]   ;;  %v1790_v8 = vld [vmem:[#allocation11 + $0xa8] sm:$0xff]   ;;  %v1793_v12 = vld [vmem:[#allocation11 + $0x20] sm:$0xff]   ;;  %p1971_p0 = pnand %p1970_p11, %p2439_p12  ;;  %s1975_s2 = scalar_lea.vmem %s1974_s6, 1024 }
  0x9e   : > { %833 = vmatprep.subr.bf16.mxu1 %v1761_v30  ;;  %v1794_v13 = vld [vmem:[#allocation11 + $0xa0] sm:$0xff]   ;;  %v1795_v14 = vld [vmem:[#allocation11 + $0x58] sm:$0xff]   ;;  %v1800_v20 = vld [vmem:[#allocation11 + $0xd0] sm:$0xff]   ;;  %p1976_p2 = scmp.lt.s32.totalorder %s1278_s14, %s1974_s6  ;;  %p1977_p5 = scmp.lt.s32.totalorder %s1975_s2, %s1969_s5 }
  0x9f   : > { %v1796_v16 = vld [vmem:[#allocation11 + $0xd8] sm:$0xff]   ;;  %v1802_v22 = vld [vmem:[#allocation11 + $0x90] sm:$0xff]   ;;  %v1803_v23 = vld [vmem:[#allocation11 + $0x48] sm:$0xff]   ;;  %p1972_p1 = pneg %p1971_p0 }
  0xa0   : > { %1605 = vmatpush3.bf16.msra.mxu0 %v1728_v19  ;;  %v1797_v17 = vld [vmem:[#allocation11 + $0x18] sm:$0xff]   ;;  %v1799_v19 = vld [vmem:[#allocation11 + $0x50] sm:$0xff]   ;;  %v1804_v24 = vld [vmem:[#allocation11 + $0xc8] sm:$0xff]   ;;  %p1978_p8 = por %p1977_p5, %p1976_p2 }
  0xa1   : > { %1606 = vmatprep.subr.bf16.mxu0 %v2087_v0  ;;  %834 = vmatpush1.bf16.msra.mxu1 %v1766_v31  ;;  %v1798_v18 = vld [vmem:[#allocation11 + $0x98] sm:$0xff]   ;;  %v1805_v25 = vld [vmem:[#allocation11 + $0x8] sm:$0xff]   ;;  %v1807_v27 = vld [vmem:[#allocation11 + $0x40] sm:$0xff]   ;;  %v653_v31 = vsub.s32 2, %v2324_v9 }
  0xa2   : > { %835 = vmatprep.subr.bf16.mxu1 %v1767_v33  ;;  %v1808_v28 = vld [vmem:[#allocation11 + $0xc0] sm:$0xff]   ;;  %v649_v33 = vsub.s32 1, %v2324_v9  ;;  %p1979_p7 = pnand %p1978_p8, %p1972_p1 }
  0xa3   : > { %v1810_v30 = vld [vmem:[#allocation11 + $0x80] sm:$0xff]  }
  0xa4   : > { %1607 = vmatpush3.bf16.msra.mxu0 %v1729_v21  ;;  %v1801_v21 = vld [vmem:[#allocation11 + $0x10] sm:$0xff]  }
  0xa5   : > { %1608 = vmatprep.subr.bf16.mxu0 %v2087_v0  ;;  %836 = vmatpush1.bf16.msra.mxu1 %v1772_v47  ;;  %v1783_v0 = vld [vmem:[#allocation11 + $0x70] sm:$0xff]  }
  0xa6   : > { %837 = vmatprep.subr.bf16.mxu1 %v1773_v48 }
  0xa8   : > { %1609 = vmatpush3.bf16.msra.mxu0 %v1730_v26  ;;  %v1806_v26 = vld [vmem:[#allocation11 + $0x88] sm:$0xff]  }
  0xa9   : > { %864 = vmatprep.subr.bf16.mxu0 %v1735_v29  ;;  %838 = vmatpush1.bf16.msra.mxu1 %v1778_v51  ;;  %v1809_v29 = vld [vmem:[#allocation11] sm:$0xff]  }
  0xaa   : > { %1550 = vmatprep.subr.bf16.mxu1 %v1779_v53 }
  0xab   : > { %1611 = vmatmul.mubr.bf16.vlgmr.msra.gmra.mxu0 %v495_v34  ;;  %v657_v34 = vsub.s32 3, %v2324_v9 }
  0xac   : > { %865 = vmatpush1.bf16.msra.mxu0 %v1733_v32  ;;  %896 = vmatprep.mubr.bf16.mxu0 %v2089_v52  ;;  %v641_v32 = vld [vmem:[%s2404_s7] sm:$0xf] }
  0xad   : > { %866 = vmatprep.subr.bf16.mxu0 %v1741_v35  ;;  %v646_v35 = vrot.slane %v641_v32, %v491_v15 }
  0xb0   : > { %867 = vmatpush1.bf16.msra.mxu0 %v1739_v36  ;;  %v654_v36 = vrot.slane %v641_v32, %v653_v31 }
  0xb1   : > { %868 = vmatprep.subr.bf16.mxu0 %v1747_v37  ;;  %v650_v37 = vrot.slane %v641_v32, %v649_v33 }
  0xb4   : > { %869 = vmatpush1.bf16.msra.mxu0 %v1745_v38  ;;  %v658_v38 = vrot.slane %v641_v32, %v657_v34 }
  0xb5   : > { %870 = vmatprep.subr.bf16.mxu0 %v1753_v39 }
  0xb8   : > { %871 = vmatpush1.bf16.msra.mxu0 %v1751_v40 }
  0xb9   : > { %872 = vmatprep.subr.bf16.mxu0 %v1759_v41 }
  0xbc   : > { %873 = vmatpush1.bf16.msra.mxu0 %v1757_v42 }
  0xbd   : > { %874 = vmatprep.subr.bf16.mxu0 %v1765_v43 }
  0xc0   : > { %875 = vmatpush1.bf16.msra.mxu0 %v1763_v44 }
  0xc1   : > { %876 = vmatprep.subr.bf16.mxu0 %v1771_v45 }
  0xc4   : > { %877 = vmatpush1.bf16.msra.mxu0 %v1769_v46 }
  0xc5   : > { %878 = vmatprep.subr.bf16.mxu0 %v1777_v49 }
  0xc8   : > { %879 = vmatpush1.bf16.msra.mxu0 %v1775_v50 }
  0xc9   : > { %1572 = vmatprep.subr.bf16.mxu0 %v1780_v54 }
 0x16b   : > { %v601_v56 = vpop.f32.mrf.mxu0 }
 0x16c   : > { %v602_v57 = vadd.f32 %v1459_v55, %v601_v56 }
 0x16d   : > { %v1612_v58 = vpop.f32.mrf.mxu0 }
 0x16e   : > { %v607_v59 = vmax.f32 %v602_v57, 0.0 }
 0x16f   : > { %v604_v60 = vpop.f32.mrf.mxu0 }
 0x170   : > { %v608_v63 = vpack.c.bf16 %v607_v59, %v607_v59 }
 0x171   : > { %v1613_v2 = vpop.f32.mrf.mxu0 }
 0x172   : > { %856 = vmatmul.mubr.bf16.vlgmr.msra.gmra.mxu1 %v608_v63  ;;  %897 = vmatmul.mubr.bf16.vlgmr.msra.gmra.mxu0 %v608_v63 }
 0x173   : > { %1551 = vmatpush3.bf16.msra.mxu1 %v1781_v61  ;;  %1573 = vmatpush3.bf16.msra.mxu0 %v1782_v62 }
 0x174   : > { %1552 = vmatprep.subr.bf16.mxu1 %v1783_v0  ;;  %1574 = vmatprep.subr.bf16.mxu0 %v1784_v1 }
 0x177   : > { %1553 = vmatpush3.bf16.msra.mxu1 %v1785_v3  ;;  %1575 = vmatpush3.bf16.msra.mxu0 %v1786_v4 }
 0x178   : > { %1554 = vmatprep.subr.bf16.mxu1 %v1787_v5  ;;  %1576 = vmatprep.subr.bf16.mxu0 %v1788_v6 }
 0x17b   : > { %1555 = vmatpush3.bf16.msra.mxu1 %v1789_v7  ;;  %1577 = vmatpush3.bf16.msra.mxu0 %v1790_v8 }
 0x17c   : > { %1556 = vmatprep.subr.bf16.mxu1 %v1791_v10  ;;  %1578 = vmatprep.subr.bf16.mxu0 %v1792_v11 }
 0x17f   : > { %1557 = vmatpush3.bf16.msra.mxu1 %v1793_v12  ;;  %1579 = vmatpush3.bf16.msra.mxu0 %v1794_v13 }
 0x180   : > { %1558 = vmatprep.subr.bf16.mxu1 %v1795_v14  ;;  %1580 = vmatprep.subr.bf16.mxu0 %v1796_v16 }
 0x183   : > { %1559 = vmatpush3.bf16.msra.mxu1 %v1797_v17  ;;  %1581 = vmatpush3.bf16.msra.mxu0 %v1798_v18 }
 0x184   : > { %1560 = vmatprep.subr.bf16.mxu1 %v1799_v19  ;;  %1582 = vmatprep.subr.bf16.mxu0 %v1800_v20 }
 0x187   : > { %1561 = vmatpush3.bf16.msra.mxu1 %v1801_v21  ;;  %1583 = vmatpush3.bf16.msra.mxu0 %v1802_v22 }
 0x188   : > { %1562 = vmatprep.subr.bf16.mxu1 %v1803_v23  ;;  %1584 = vmatprep.subr.bf16.mxu0 %v1804_v24 }
 0x18b   : > { %1563 = vmatpush3.bf16.msra.mxu1 %v1805_v25  ;;  %1585 = vmatpush3.bf16.msra.mxu0 %v1806_v26 }
 0x18c   : > { %1564 = vmatprep.subr.bf16.mxu1 %v1807_v27  ;;  %1586 = vmatprep.subr.bf16.mxu0 %v1808_v28 }
 0x18f   : > { %1565 = vmatpush3.bf16.msra.mxu1 %v1809_v29  ;;  %1587 = vmatpush3.bf16.msra.mxu0 %v1810_v30 }
 0x232   : > { %v857_v39 = vpop.f32.mrf.mxu1  ;;  %v898_v40 = vpop.f32.mrf.mxu0 }
 0x233   : > { %v858_v41 = vadd.f32 %v857_v39, %v646_v35  ;;  %v899_v42 = vadd.f32 %v898_v40, %v654_v36 }
 0x234   : > { %v859_v43 = vpop.f32.mrf.mxu1  ;;  %v900_v44 = vpop.f32.mrf.mxu0 }
 0x235   : > { %905 = vst [vmem:[%s474_s15] sm:$0xff] %v858_v41  ;;  %907 = vst [vmem:[%s474_s15 + $0x10] sm:$0xff] %v899_v42  ;;  %v860_v45 = vadd.f32 %v859_v43, %v650_v37  ;;  %v901_v46 = vadd.f32 %v900_v44, %v658_v38  ;;  %v909_v49 = vpack.c.bf16 %v858_v41, %v858_v41 }
 0x236   : > { %v861_v47 = vpop.f32.mrf.mxu1  ;;  %v902_v48 = vpop.f32.mrf.mxu0  ;;  %v911_v50 = vpack.c.bf16 %v899_v42, %v899_v42 }
 0x237   : > { %906 = vst [vmem:[%s474_s15 + $0x8] sm:$0xff] %v860_v45  ;;  %v910_v9 = vpack.c.bf16 %v860_v45, %v860_v45  ;;  %908 = vst [vmem:[%s474_s15 + $0x18] sm:$0xff] %v901_v46  ;;  %v912_v15 = vpack.c.bf16 %v901_v46, %v901_v46 }
 0x238   : > { %v862_v51 = vpop.f32.mrf.mxu1  ;;  %v903_v52 = vpop.f32.mrf.mxu0 }
 0x239   : > { %1208 = vmatprep.mubr.bf16.mxu1 %v910_v9  ;;  %1248 = vmatprep.mubr.bf16.mxu0 %v912_v15 }
 0x23a   : > { %1209 = vmatmul.mubr.bf16.vlgmr.msra.gmra.mxu1 %v909_v49  ;;  %1249 = vmatmul.mubr.bf16.vlgmr.msra.gmra.mxu0 %v911_v50 }
 0x23b   : > { %1982 = shalt.err (!%p1979_p7)
}
 0x23c   : > { %s1983_s8 = scalar_lea.hbm %s1275_s21, 512  ;;  %s1987_s3 = scalar_lea.hbm %s2407_s10, 1024 }
 0x23d   : > { %p1984_p13 = scmp.ne.s32.totalorder %s1275_s21, %s1983_s8  ;;  %p1988_p4 = scmp.lt.s32.totalorder %s1275_s21, %s2407_s10 }
 0x23e   : > { %p1989_p9 = scmp.lt.s32.totalorder %s1987_s3, %s1983_s8 }
 0x23f   : > { %p1985_p6 = pnand %p1984_p13, %p2439_p12 }
 0x240   : > { %p1990_p10 = por %p1989_p9, %p1988_p4 }
 0x241   : > { %p1986_p3 = pneg %p1985_p6 }
 0x243   : > { %p1991_p11 = pnand %p1990_p10, %p1986_p3 }
 0x245   : > { %1994 = shalt.err (!%p1991_p11)
}
 0x246   : > { %1636 = dma.vmem_to_hbm [thread:$0]  (%p2439_p12), %s1278_s14, 512, %s1275_s21, %s1258_s30   ;;  %v1500_v55 = vld [vmem:[%s2406_s9] ss:$0 sm:$0xff] }
 0x247   : > { %s1458_s12 = sshll.u32 %s2304_s4, 3  ;;  %s1537_s25 = sshll.u32 %s2173_s22, 7 }
 0x248   : > { %s481_s6 = scalar_lea.vmem [#allocation14], %s1458_s12  ;;  %s1288_s30 = scalar_lea.hbm %s2408_s11, %s1537_s25 }
 0x249   : > { %s1290_s2 = sshll.u32 %s481_s6, 4  ;;  %s1263_s8 = scalar_lea.sflag [#allocation15], %s2304_s4  ;;  %s1291_s2 = int_to_ptr.vmem [resolvable:$true] %s1290_s2 }
 0x24a   : > { %s1995_s23 = scalar_lea.vmem %s1291_s2, 128  ;;  %s2091_s22 = smov [#allocation14]  }
 0x24b   : > { %p1996_p0 = scmp.ne.s32.totalorder %s1291_s2, %s1995_s23  ;;  %s1999_s24 = sshll.u32 %s2091_s22, 4  ;;  %s2000_s24 = int_to_ptr.vmem [resolvable:$false] %s1999_s24 }
 0x24c   : > { %s2001_s3 = scalar_lea.vmem %s2000_s24, 256  ;;  %p2002_p5 = scmp.lt.s32.totalorder %s1291_s2, %s2000_s24 }
 0x24d   : > { %p1997_p1 = pnand %p1996_p0, %p2439_p12  ;;  %p2003_p8 = scmp.lt.s32.totalorder %s2001_s3, %s1995_s23 }
 0x24f   : > { %p1998_p2 = pneg %p1997_p1  ;;  %p2004_p7 = por %p2003_p8, %p2002_p5 }
 0x251   : > { %p2005_p13 = pnand %p2004_p7, %p1998_p2 }
 0x2fa   : > { %v1566_v53 = vpop.f32.mrf.mxu1  ;;  %v1588_v54 = vpop.f32.mrf.mxu0 }
 0x2fc   : > { %v1567_v56 = vpop.f32.mrf.mxu1  ;;  %v1589_v57 = vpop.f32.mrf.mxu0 }
 0x2fd   : > { %v1568_v58 = vadd.f32 %v1567_v56, %v1566_v53  ;;  %v1590_v62 = vadd.f32 %v1589_v57, %v1588_v54 }
 0x2fe   : > { %v1569_v59 = vpop.f32.mrf.mxu1  ;;  %v1591_v60 = vpop.f32.mrf.mxu0 }
 0x2ff   : > { %v1211_v61 = vadd.f32 %v1568_v58, %v1500_v55 }
 0x300   : > { %v1570_v63 = vpop.f32.mrf.mxu1  ;;  %v1592_v0 = vpop.f32.mrf.mxu0 }
 0x301   : > { %v1251_v1 = vadd.f32 %v1590_v62, %v1211_v61 }
 0x303   : > { %1256 = vst [vmem:[%s481_s6] sm:$0xff] %v1251_v1 }
 0x304   : > { %2008 = shalt.err (!%p2005_p13)
}
 0x305   : > { %s2009_s15 = scalar_lea.hbm %s1288_s30, 128  ;;  %s2013_s12 = scalar_lea.hbm %s2408_s11, 256 }
 0x306   : > { %p2010_p6 = scmp.ne.s32.totalorder %s1288_s30, %s2009_s15  ;;  %p2014_p9 = scmp.lt.s32.totalorder %s1288_s30, %s2408_s11 }
 0x307   : > { %p2015_p10 = scmp.lt.s32.totalorder %s2013_s12, %s2009_s15 }
 0x308   : > { %p2011_p3 = pnand %p2010_p6, %p2439_p12 }
 0x309   : > { %p2016_p11 = por %p2015_p10, %p2014_p9 }
 0x30a   : > { %p2012_p4 = pneg %p2011_p3 }
 0x30c   : > { %p2017_p0 = pnand %p2016_p11, %p2012_p4 }
 0x30e   : > { %2020 = shalt.err (!%p2017_p0)
}
 0x30f   : > { %1637 = dma.vmem_to_hbm [thread:$0]  (%p2439_p12), %s1291_s2, 128, %s1288_s30, %s1263_s8  }
 0x310 PF: > { %s1302_s25 = sand.u32 1, %s2063_s16   ;;  %p2440_p1 = scmp.ne.s32.totalorder %s2429_s27, 0 }
 0x311   : > { %p2441_p2 = scmp.ge.s32.totalorder %s2075_s19, 2  ;;  %s1303_s6 = scalar_lea.sflag [#allocation4], %s1302_s25 }
 0x313   : > { %p1661_p5 = pnand %p2441_p2, %p2440_p1 }
 0x315   : > { %p1662_p8 = pneg %p1661_p5 }
 0x317   : > { %2054 = dma.done.wait (%p1662_p8), %s1303_s6, 512  }
 0x318   : > { %2056 = vsyncadd (%p1662_p8), %s1303_s6, 4294966784  ;;  %s1312_s21 = scalar_lea.sflag [#allocation15], %s1302_s25 }
 0x319   : > { %2058 = dma.done.wait (%p1662_p8), %s1312_s21, 128  }
 0x31a   : > { %2060 = vsyncadd (%p1662_p8), %s1312_s21, 4294967168  ;;  %p31_p12 = scmp.ge.s32.totalorder %s2247_s29, 4   ;;  %s2442_s16 = smov %s2067_s17 }
 0x31b   : > { %s2443_s17 = smov %s2071_s18  ;;  %s2444_s18 = smov %s2259_s20 }
 0x31c   : > { %s2445_s19 = smov %s2247_s29  ;;  %33 = sbr.rel (!%p31_p12) target bundleno = 16 (0x10), region = 142 }
 0x321   :  { %1317 = vsyncpa [#allocation3], 1 }
 0x322   :  { %1319 = vsyncpa [#allocation3 + $0x1], 1 }
 0x323   :  { %1320 = vsyncpa [#allocation6], 1 }
 0x324   :  { %1321 = vsyncpa [#allocation9], 1 }
 0x325   :  { %1322 = vsyncpa [#allocation12], 1 }
 0x326   :  { %1323 = vsyncpa [#allocation4], 1 }
 0x327   :  { %1325 = vsyncpa [#allocation4 + $0x1], 1 }
 0x328   :  { %1326 = vsyncpa [#allocation15], 1 }
 0x329   :  { %1328 = vsyncpa [#allocation15 + $0x1], 1 }

</bundles_post_ra>
